<compile_context>
chip_gen: v5e
topology: v5e:2x2
jax: 0.10.0
libtpu: 0.0.40
codegen_flags: <defaults>
</compile_context>

<pallas_src>
import jax
import jax.numpy as jnp
from jax import lax
from jax.experimental import pallas as pl
from jax.experimental.pallas import tpu as pltpu

LRELU_SLOPE = 0.2
GN_EPS = 1e-5
# Cast kernel operands to bf16 once the contraction (2C) is large enough that the
# kernel is HBM-bound and the accuracy trade is worthwhile.
_BF16_K_THRESHOLD = 256
_HIGH = lax.Precision.HIGH  # bf16_3x on TPU: ~f32 accuracy at 1/2 the HIGHEST passes


def _fourier_unit_kernel(x_ref, w_ref, scale_ref, shift_ref, o_ref):
    """One (spatial-tile, batch) grid step; channel-major / lane-dense.

    x_ref     : (1, 2C, tn)     concatenated [real | imag] FFT features, N on lanes
    w_ref     : (2Cout, 2C)     merged 1x1-conv weight  W_cat = [wr | wi]
    scale_ref : (1, 2Cout, 1)   folded GroupNorm scale  = rstd_b * gamma_c
    shift_ref : (1, 2Cout, 1)   folded GroupNorm shift  = beta_c - mean_b * scale
    o_ref     : (1, 2Cout, tn)  f32 output
    """
    # Single K=2C matmul on the MXU (real/imag folded into the contraction),
    # f32 accumulation regardless of operand dtype (bf16 at large C).
    y = jnp.dot(w_ref[...], x_ref[0], preferred_element_type=jnp.float32)
    # GroupNorm(groups=1) normalize + affine folded into one per-(batch,ch) FMA.
    y = y * scale_ref[0] + shift_ref[0]
    # LeakyReLU(0.2) on full-width lanes; VPU work rides under the DMA.
    o_ref[0] = jnp.where(y >= 0, y, LRELU_SLOPE * y)


def _vmem_bytes(tn, c2, cout2, in_bytes):
    """Honest per-step VMEM footprint for the pipeline at spatial tile tn."""
    x_tiles = 2 * c2 * tn * in_bytes        # double-buffered input tile
    o_tiles = 2 * cout2 * tn * 4            # double-buffered f32 output tile
    weights = 2 * cout2 * c2 * in_bytes     # weight (budgeted double-buffered)
    affine = 2 * 2 * cout2 * 4              # scale + shift (tiny)
    temps = 2 * cout2 * tn * 4              # matmul result + epilogue temporaries
    return int(1.15 * (x_tiles + o_tiles + weights + affine + temps))


def _plan_tiles(n, c2, cout2, in_bytes):
    """Chip-aware spatial tile + VMEM request (v7x: 64 MiB/TC vs 128 MiB v5e/v6e)."""
    try:
        vmem_cap = int(pltpu.get_tpu_info().vmem_capacity_bytes)
    except Exception:  # conservative fallback (e.g. interpret mode)
        vmem_cap = 64 * 1024 * 1024
    small_vmem = vmem_cap <= 80 * 1024 * 1024          # v7x
    cap = (36 if small_vmem else 64) * 1024 * 1024
    max_tn = 1024 if small_vmem else 2048

    tn = max_tn
    while tn > 128 and _vmem_bytes(tn, c2, cout2, in_bytes) > cap:
        tn //= 2
    if tn >= n:
        # Single full-extent block (always a legal BlockSpec); nothing to pipeline.
        tn = n
    vmem_limit = min(cap, max(8 * 1024 * 1024, _vmem_bytes(tn, c2, cout2, in_bytes)))
    return int(tn), int(vmem_limit)


def _conv_gn_lrelu_pallas(x_cat, w_cat, scale, shift):
    """(B, 2C, N) -> (B, 2Cout, N): merged 1x1 conv + folded GN affine + LeakyReLU."""
    B, C2, N = x_cat.shape
    Cout2 = w_cat.shape[0]
    in_bytes = x_cat.dtype.itemsize
    tn, vmem_limit = _plan_tiles(N, C2, Cout2, in_bytes)
    grid_n = pl.cdiv(N, tn)

    scale3 = scale.reshape(B, Cout2, 1).astype(jnp.float32)
    shift3 = shift.reshape(B, Cout2, 1).astype(jnp.float32)

    return pl.pallas_call(
        _fourier_unit_kernel,
        out_shape=jax.ShapeDtypeStruct((B, Cout2, N), jnp.float32),
        grid_spec=pltpu.PrefetchScalarGridSpec(
            num_scalar_prefetch=0,
            # Spatial axis first so the v7x megacore shard falls on it even at B=1;
            # ragged last spatial tile is handled by Pallas' masked writes.
            grid=(grid_n, B),
            in_specs=[
                pl.BlockSpec((1, C2, tn), lambda n, b: (b, 0, n)),
                pl.BlockSpec((Cout2, C2), lambda n, b: (0, 0)),     # resident weight
                pl.BlockSpec((1, Cout2, 1), lambda n, b: (b, 0, 0)),
                pl.BlockSpec((1, Cout2, 1), lambda n, b: (b, 0, 0)),
            ],
            out_specs=pl.BlockSpec((1, Cout2, tn), lambda n, b: (b, 0, n)),
        ),
        compiler_params=pltpu.CompilerParams(
            # Both axes are truly independent (GN stats precomputed in the wrapper).
            dimension_semantics=("parallel", "parallel"),
            vmem_limit_bytes=vmem_limit,
        ),
    )(x_cat, w_cat, scale3, shift3)


def fourier_unit_forward(x, weight, gamma, beta):
    """Pallas-backed FourierUnit forward.

    x      : (B, C, H, W) float32 (NCHW, like the PyTorch module)
    weight : (2*Cout, 2*C) float32 -- Conv2d(2C, 2Cout, k=1, bias=False) weight
             squeezed; column 2c multiplies real(c), column 2c+1 multiplies imag(c)
    gamma, beta : (2*Cout,) float32 -- GroupNorm(1, 2*Cout) affine
    returns: (B, Cout, H, W) float32
    """
    B, C, H, W = x.shape
    Cout2 = weight.shape[0]
    Cout = Cout2 // 2

    # TODO(synk): rfft2/irfft2 have no Pallas TPU equivalent; kept in plain JAX/XLA.
    ffted = jnp.fft.rfft2(x, axes=(-2, -1), norm="ortho")          # (B, C, H, Wf)
    Wf = ffted.shape[-1]
    N = H * Wf

    # Merged real/imag activation stream: one (B, 2C, N) array, one K=2C matmul.
    x_cat = jnp.concatenate(
        [jnp.real(ffted).reshape(B, C, N), jnp.imag(ffted).reshape(B, C, N)],
        axis=1).astype(jnp.float32)                                # (B, 2C, N)
    C2 = 2 * C

    # Parameter reshuffle (tiny, outside the hot path):
    #   rows    -> [real-out | imag-out] so kernel outputs split with contiguous slices,
    #   columns -> [real-in  | imag-in ] to match x_cat's channel concat.
    row_order = jnp.concatenate([jnp.arange(0, Cout2, 2), jnp.arange(1, Cout2, 2)])
    w_rows = weight[row_order].astype(jnp.float32)                 # (2Cout, 2C)
    w_cat = jnp.concatenate([w_rows[:, 0::2], w_rows[:, 1::2]], axis=1)
    gamma_r = gamma[row_order].astype(jnp.float32)
    beta_r = beta[row_order].astype(jnp.float32)

    # GroupNorm(groups=1) statistics from x's channel moments, single pass, CENTERED:
    #   y_on - mean_b = (W_cat (x_n - xbar))_on + (ybar_o - mean_b)
    #   var_b = tr(G Zc)/(2Cout*N) + Var_o(ybar),  G = W^T W,  Zc = sum_n xc xc^T
    # Both terms are non-negative -> no catastrophic cancellation at HIGH precision.
    xbar = jnp.mean(x_cat, axis=-1)                                # (B, 2C)
    ybar = jnp.einsum("oc,bc->bo", w_cat, xbar, precision=_HIGH)   # (B, 2Cout)
    mean = jnp.mean(ybar, axis=-1)                                 # (B,)
    xc = x_cat - xbar[:, :, None]
    zc = jnp.einsum("bcn,bdn->bcd", xc, xc, precision=_HIGH)       # (B, 2C, 2C)
    gram_w = jnp.einsum("oc,od->cd", w_cat, w_cat, precision=_HIGH)  # (2C, 2C)
    var = (jnp.sum(gram_w[None] * zc, axis=(-2, -1)) / (Cout2 * N)
           + jnp.var(ybar, axis=-1))                               # (B,)
    rstd = lax.rsqrt(var + GN_EPS)

    # Fold normalization + affine into one per-(batch, out-channel) scale/shift.
    scale = rstd[:, None] * gamma_r[None, :]                       # (B, 2Cout)
    shift = beta_r[None, :] - mean[:, None] * scale

    # Pad output channels to a sublane multiple (unpadded full-sublane stores on
    # v5e); padded rows get zero weight/scale/shift and are sliced away below.
    Cout2_pad = ((Cout2 + 7) // 8) * 8
    if Cout2_pad != Cout2:
        pad = Cout2_pad - Cout2
        w_cat = jnp.pad(w_cat, ((0, pad), (0, 0)))
        scale = jnp.pad(scale, ((0, 0), (0, pad)))
        shift = jnp.pad(shift, ((0, 0), (0, pad)))

    # HBM-bound at realistic channel counts -> bf16 operands, f32 accumulation.
    kdt = jnp.bfloat16 if C2 >= _BF16_K_THRESHOLD else jnp.float32
    y = _conv_gn_lrelu_pallas(x_cat.astype(kdt), w_cat.astype(kdt), scale, shift)

    # Rows are [real-out | imag-out]: contiguous slices + reshape only, then iFFT.
    y_re = y[:, :Cout].reshape(B, Cout, H, Wf)
    y_im = y[:, Cout:Cout2].reshape(B, Cout, H, Wf)
    out = jnp.fft.irfft2(lax.complex(y_re, y_im), s=(H, W), axes=(-2, -1), norm="ortho")
    return out.astype(jnp.float32)


def _reference_forward(x, weight, gamma, beta):
    """Pure-JAX reference (mirrors the PyTorch module) for a sanity check."""
    B, C, H, W = x.shape
    ffted = jnp.fft.rfft2(x, axes=(-2, -1), norm="ortho")
    Wf = ffted.shape[-1]
    stacked = jnp.stack([jnp.real(ffted), jnp.imag(ffted)], axis=2).reshape(B, 2 * C, H, Wf)
    y = jnp.einsum("oc,bchw->bohw", weight, stacked)               # 1x1 conv, bias=False
    mean = jnp.mean(y, axis=(1, 2, 3), keepdims=True)              # GroupNorm groups=1
    var = jnp.var(y, axis=(1, 2, 3), keepdims=True)
    y = (y - mean) / jnp.sqrt(var + GN_EPS)
    y = y * gamma[None, :, None, None] + beta[None, :, None, None]
    y = jnp.where(y >= 0, y, LRELU_SLOPE * y)                      # LeakyReLU(0.2)
    y_cplx = y[:, 0::2] + 1j * y[:, 1::2]
    return jnp.fft.irfft2(y_cplx, s=(H, W), axes=(-2, -1), norm="ortho")


if __name__ == "__main__":
    B, C, H, W = 2, 4, 16, 16       # in_channels = out_channels = 4, groups = 1
    Cout = C

    key = jax.random.PRNGKey(0)
    kx, kw, kb = jax.random.split(key, 3)

    x = jax.random.normal(kx, (B, C, H, W), dtype=jnp.float32)

    # Conv2d(in=2C, out=2Cout, k=1, bias=False) weight, deterministic init.
    weight = (jax.random.normal(kw, (2 * Cout, 2 * C), dtype=jnp.float32)
              * (1.0 / jnp.sqrt(2.0 * C)))
    # GroupNorm affine params (nontrivial but deterministic).
    gamma = 1.0 + 0.1 * jax.random.normal(kb, (2 * Cout,), dtype=jnp.float32)
    beta = 0.05 * jnp.arange(2 * Cout, dtype=jnp.float32)

    out = jax.block_until_ready(fourier_unit_forward(x, weight, gamma, beta))
    ref = jax.block_until_ready(_reference_forward(x, weight, gamma, beta))

    assert out.shape == (B, Cout, H, W)
    err = float(jnp.max(jnp.abs(out - ref)))
    assert err < 2e-4, f"max abs err {err}"

    print("KERNEL_OK")
</pallas_src>

<mosaic_0001>
module attributes {stable_mosaic.version = 11 : i64} {
  func.func @_fourier_unit_kernel(%arg0: i32, %arg1: i32, %arg2: memref<1x8x144xf32, #tpu.memory_space<vmem>>, %arg3: memref<8x8xf32, #tpu.memory_space<vmem>>, %arg4: memref<1x8x1xf32, #tpu.memory_space<vmem>>, %arg5: memref<1x8x1xf32, #tpu.memory_space<vmem>>, %arg6: memref<1x8x144xf32, #tpu.memory_space<vmem>>) attributes {dimension_semantics = [#tpu.dimension_semantics<parallel>, #tpu.dimension_semantics<parallel>], iteration_bounds = array<i64: 1, 2>, scalar_prefetch = 0 : i64, scratch_operands = 0 : i64, tpu.core_type = #tpu.core_type<tc>, window_params = [{transform_indices = @transform_0, window_bounds = array<i64: 1, 8, 144>}, {pipeline_mode = #tpu.pipeline_mode<synchronous>, transform_indices = @transform_1, window_bounds = array<i64: 8, 8>}, {transform_indices = @transform_2, window_bounds = array<i64: 1, 8, 1>}, {transform_indices = @transform_3, window_bounds = array<i64: 1, 8, 1>}, {transform_indices = @transform_4, window_bounds = array<i64: 1, 8, 144>}]} {
    %c0 = arith.constant 0 : index
    %c0_0 = arith.constant 0 : index
    %0 = vector.load %arg3[%c0, %c0_0] : memref<8x8xf32, #tpu.memory_space<vmem>>, vector<8x8xf32>
    %c0_1 = arith.constant 0 : index
    %c0_2 = arith.constant 0 : index
    %c0_3 = arith.constant 0 : index
    %1 = vector.load %arg2[%c0_1, %c0_2, %c0_3] : memref<1x8x144xf32, #tpu.memory_space<vmem>>, vector<1x8x144xf32>
    %2 = vector.shape_cast %1 : vector<1x8x144xf32> to vector<8x144xf32>
    %cst = arith.constant dense<0.000000e+00> : vector<8x144xf32>
    %3 = tpu.matmul %0, %2, %cst {dimension_numbers = #tpu.dot_dimension_numbers<[1], [0], [0], [1], [0, 0, 1, 1], [], []>} : vector<8x8xf32>, vector<8x144xf32>, vector<8x144xf32> -> vector<8x144xf32>
    %c0_4 = arith.constant 0 : index
    %c0_5 = arith.constant 0 : index
    %c0_6 = arith.constant 0 : index
    %4 = vector.load %arg4[%c0_4, %c0_5, %c0_6] : memref<1x8x1xf32, #tpu.memory_space<vmem>>, vector<1x8x1xf32>
    %5 = vector.shape_cast %4 : vector<1x8x1xf32> to vector<8x1xf32>
    %6 = vector.broadcast %5 : vector<8x1xf32> to vector<8x144xf32>
    %7 = arith.mulf %3, %6 : vector<8x144xf32>
    %c0_7 = arith.constant 0 : index
    %c0_8 = arith.constant 0 : index
    %c0_9 = arith.constant 0 : index
    %8 = vector.load %arg5[%c0_7, %c0_8, %c0_9] : memref<1x8x1xf32, #tpu.memory_space<vmem>>, vector<1x8x1xf32>
    %9 = vector.shape_cast %8 : vector<1x8x1xf32> to vector<8x1xf32>
    %10 = vector.broadcast %9 : vector<8x1xf32> to vector<8x144xf32>
    %11 = arith.addf %7, %10 : vector<8x144xf32>
    %cst_10 = arith.constant 0.000000e+00 : f32
    %12 = vector.broadcast %cst_10 : f32 to vector<8x144xf32>
    %13 = arith.cmpf oge, %11, %12 : vector<8x144xf32>
    %cst_11 = arith.constant 2.000000e-01 : f32
    %14 = vector.broadcast %cst_11 : f32 to vector<8x144xf32>
    %15 = arith.mulf %14, %11 : vector<8x144xf32>
    %16 = arith.select %13, %11, %15 : vector<8x144xi1>, vector<8x144xf32>
    %c0_12 = arith.constant 0 : index
    %c0_13 = arith.constant 0 : index
    %c0_14 = arith.constant 0 : index
    %17 = vector.load %arg6[%c0_12, %c0_13, %c0_14] : memref<1x8x144xf32, #tpu.memory_space<vmem>>, vector<1x8x144xf32>
    %18 = vector.shape_cast %17 : vector<1x8x144xf32> to vector<8x144xf32>
    %19 = vector.shape_cast %16 : vector<8x144xf32> to vector<1x8x144xf32>
    tpu.vector_store %arg6[%c0_12, %c0_13, %c0_14], %19 {strides = array<i32>} : memref<1x8x144xf32, #tpu.memory_space<vmem>>, vector<1x8x144xf32>,
    return
  }
  func.func @transform_0(%arg0: i32, %arg1: i32) -> (i32, i32, i32) {
    %c0_i32 = arith.constant 0 : i32
    %c0_i32_0 = arith.constant 0 : i32
    return %arg1, %c0_i32, %arg0 : i32, i32, i32
  }
  func.func @transform_1(%arg0: i32, %arg1: i32) -> (i32, i32) {
    %c0_i32 = arith.constant 0 : i32
    %c0_i32_0 = arith.constant 0 : i32
    %c0_i32_1 = arith.constant 0 : i32
    return %c0_i32, %c0_i32_0 : i32, i32
  }
  func.func @transform_2(%arg0: i32, %arg1: i32) -> (i32, i32, i32) {
    %c0_i32 = arith.constant 0 : i32
    %c0_i32_0 = arith.constant 0 : i32
    %c0_i32_1 = arith.constant 0 : i32
    return %arg1, %c0_i32, %c0_i32_0 : i32, i32, i32
  }
  func.func @transform_3(%arg0: i32, %arg1: i32) -> (i32, i32, i32) {
    %c0_i32 = arith.constant 0 : i32
    %c0_i32_0 = arith.constant 0 : i32
    %c0_i32_1 = arith.constant 0 : i32
    return %arg1, %c0_i32, %c0_i32_0 : i32, i32, i32
  }
  func.func @transform_4(%arg0: i32, %arg1: i32) -> (i32, i32, i32) {
    %c0_i32 = arith.constant 0 : i32
    %c0_i32_0 = arith.constant 0 : i32
    return %arg1, %c0_i32, %arg0 : i32, i32, i32
  }
}

</mosaic_0001>

<bundles_post_ra>
// kernel: tpu_custom_call.1
= control target key start
LH: loop header
LB: loop body
LE: loop exit
PB: predicated region body
PF: predicated region fallthrough
CT: control target
= control target key end

     0   :  { %9 = vsyncpa [#allocation3], 0  ;;  %s815_s0 = inlined_call_operand.vmem [shape: f32[2,8,144], index: 0, kind: input, shape index: {}]   ;;  %s816_s1 = inlined_call_operand.hbm [shape: f32[8,8], index: 1, kind: input, shape index: {}]   ;;  %s817_s2 = inlined_call_operand.vmem [shape: f32[2,8,1], index: 2, kind: input, shape index: {}]   ;;  %s818_s3 = inlined_call_operand.vmem [shape: f32[2,8,1], index: 3, kind: input, shape index: {}]   ;;  %s819_s4 = inlined_call_operand.hbm [shape: f32[2,8,144], index: 4, kind: output, shape index: {}]  }
   0x1   :  { %10 = vsyncpa [#allocation4], 0 }
   0x2   :  { %12 = vsyncpa [#allocation4 + $0x1], 0  ;;  %s709_s15 = smov 0   ;;  %s711_s16 = smov 0  }
   0x3   :  { %s713_s17 = smov 0   ;;  %s715_s18 = smov 0  }
   0x4   :  { %s717_s19 = smov 0   ;;  %s719_s20 = smov 0  }
   0x5 LB: > { %s479_s21 = sadd.s32 4294967295, %s680_s20   ;;  %s480_s22 = sadd.s32 4294967294, %s680_s20   ;;  %s680_s20 = sphi %s719_s20, %s18_s20   ;;  %s676_s19 = sphi %s717_s19, %s826_s19   ;;  %s672_s18 = sphi %s715_s18, %s825_s18   ;;  %s668_s17 = sphi %s713_s17, %s824_s17   ;;  %s664_s16 = sphi %s711_s16, %s823_s16   ;;  %s660_s15 = sphi %s709_s15, %s822_s15  }
   0x6   : > { %s27_s23 = sadd.s32 1, %s676_s19  ;;  %s140_s24 = sadd.s32 1, %s668_s17 }
   0x7   : > { %p28_p0 = scmp.ge.s32.totalorder %s27_s23, 2  ;;  %p150_p1 = scmp.ne.s32.totalorder %s668_s17, %s664_s16 }
   0x8   : > { %p151_p2 = scmp.eq.s32.totalorder %s479_s21, 1  ;;  %p156_p3 = scmp.ne.s32.totalorder %s664_s16, %s660_s15 }
   0x9   : > { %s828_s23 = smov (%p28_p0, %s27_s23), 0  ;;  %p157_p5 = scmp.eq.s32.totalorder %s480_s22, 1 }
   0xa   : > { %p749_p4 = por %p151_p2, %p150_p1  ;;  %s135_s26 = ssub.s32 %s676_s19, %s828_s23 }
   0xb   : > { %p481_p6 = scmp.ge.s32.totalorder %s680_s20, 1  ;;  %p138_p7 = scmp.eq.s32.totalorder %s135_s26, 0 }
   0xc   : > { %p756_p8 = por %p157_p5, %p156_p3  ;;  %p164_p9 = scmp.lt.s32.totalorder %s680_s20, 3 }
   0xd   : > { %s762_s28 = scalar_select %p138_p7, %s668_s17, %s140_s24  }
   0xe   : > { %p165_p10 = pnand %p481_p6, %p164_p9  ;;  %p514_p11 = scmp.eq.s32.totalorder %s479_s21, 0 }
   0xf   : > { %s176_s5 = sshll.u32 %s816_s1, 4  ;;  %s682_s6 = smov [#allocation2]   ;;  %s177_s5 = int_to_ptr.hbm [resolvable:$true] %s176_s5 }
  0x10   : > { %p506_p12 = pneg %p165_p10  ;;  %s178_s7 = sshll.u32 %s682_s6, 4  ;;  %s179_s7 = int_to_ptr.vmem [resolvable:$true] %s178_s7 }
  0x11   : > { %218 = sbr.rel (%p165_p10) target bundleno = 168 (0xa8), region = 36 }
  0x12   : > { %p507_p13 = pnand %p514_p11, %p506_p12 }
  0x14   : > { %509 = dma.hbm_to_vmem [thread:$0]  (!%p507_p13), %s177_s5, 128, %s179_s7, [#allocation3]  }
  0x16   : > { %651 = dma.done.wait (%p514_p11), [#allocation3], 128  }
  0x17   : > { %653 = vsyncadd (%p514_p11), [#allocation3], 4294967168  ;;  %p258_p0 = scmp.lt.s32.totalorder %s672_s18, 1  ;;  %v683_v0 = vmov 0   ;;  %vm279_vm0 = vcmask 64512   ;;  %v276_v4 = vld [vmem:[#allocation2] sm:$0xff] }
  0x18   : > { %567 = vset.pattern.permute.xlu0 %v683_v0  ;;  %s254_s30 = sand.u32 1, %s664_s16   ;;  %s499_s6 = sshll.u32 %s672_s18, 4  ;;  %vm346_vm3 = vcmask 130048  }
  0x19   : > { %s259_s8 = scalar_select %p258_p0, %s672_s18, 1 }
  0x1a   : > { %s486_s5 = sshll.u32 %s254_s30, 4  ;;  %s349_s18 = scalar_lea.sflag [#allocation4], %s254_s30 }
  0x1b   : > { %s489_s9 = sshll.u32 %s259_s8, 3  ;;  %s498_s10 = sshll.u32 %s259_s8, 4 }
  0x1c   : > { %s270_s13 = scalar_lea.vmem %s817_s2, %s489_s9  ;;  %s265_s22 = scalar_lea.vmem %s815_s0, %s498_s10 }
  0x1d   : > { %v323_v1 = vld [vmem:[%s270_s13] sm:$0xff]  ;;  %v278_v3 = vld [vmem:[%s265_s22 + $0x8] sm:$0xff]  ;;  %s274_s29 = scalar_lea.vmem %s818_s3, %s489_s9  ;;  %s362_s10 = scalar_lea.hbm %s819_s4, %s499_s6 }
  0x1e   : > { %v277_v2 = vld [vmem:[%s265_s22] sm:$0xff]  ;;  %326 = vperm.xlu0 %567, %v323_v1   ;;  %318 = vmatpush.msra.mxu1 %v278_v3  ;;  %s256_s11 = scalar_lea.vmem [#allocation5], %s486_s5  ;;  %s366_s9 = sshll.u32 %s362_s10, 4  ;;  %s367_s9 = int_to_ptr.hbm [resolvable:$true] %s366_s9 }
  0x1f   : > { %298 = vmatpush.msra.mxu0 %v277_v2  ;;  %492 = vmatmul.msk.f32.vlgmr.msra.gmra.mxu1 %vm279_vm0, %v276_v4  ;;  %v331_v5 = vld [vmem:[%s274_s29] sm:$0xff]  ;;  %s364_s12 = sshll.u32 %s256_s11, 4  ;;  %s612_s13 = sshra.s32 %s367_s9, 4  ;;  %s365_s12 = int_to_ptr.vmem [resolvable:$true] %s364_s12  ;;  %s613_s13 = int_to_ptr.hbm [resolvable:$true] %s612_s13 }
  0x20   : > { %491 = vmatmul.msk.f32.vlgmr.msra.gmra.mxu0 %vm279_vm0, %v276_v4  ;;  %s614_s14 = scalar_lea.hbm %s613_s13, 16  ;;  %s618_s24 = scalar_lea.hbm %s819_s4, 32 }
  0x21   : > { %p615_p1 = scmp.ne.s32.totalorder %s613_s13, %s614_s14  ;;  %p619_p5 = scmp.lt.s32.totalorder %s613_s13, %s819_s4 }
  0x22   : > { %p620_p6 = scmp.lt.s32.totalorder %s618_s24, %s614_s14 }
  0x23   : > { %p616_p2 = pnand %p615_p1, %p749_p4 }
  0x24   : > { %p621_p7 = por %p620_p6, %p619_p5 }
  0x25   : > { %p617_p3 = pneg %p616_p2 }
  0x26   : > { %334 = vperm.xlu0 %567, %v331_v5  }
  0x27   : > { %p622_p9 = pnand %p621_p7, %p617_p3 }
  0x90   : > { %v327_v6 = vpop.permute.xlu0 %326 }
  0x98   : > { %v335_v10 = vpop.permute.xlu0 %334 }
  0x9c   : > { %v320_v9 = vpop.f32.mrf.mxu1 }
  0x9d   : > { %v300_v7 = vpop.f32.mrf.mxu0  ;;  %v330_v11 = vmul.f32 %v327_v6, %v320_v9 }
  0x9e   : > { %v329_v8 = vmul.f32 %v327_v6, %v300_v7 }
  0x9f   : > { %v338_v13 = vadd.f32 %v335_v10, %v330_v11 }
  0xa0   : > { %v337_v12 = vadd.f32 %v335_v10, %v329_v8 }
  0xa1   : > { %vm340_vm2 = vcmp.ge.f32.partialorder %v338_v13, 0.0  ;;  %v342_v15 = vmul.f32 0.2, %v338_v13 }
  0xa2   : > { %vm339_vm1 = vcmp.ge.f32.partialorder %v337_v12, 0.0  ;;  %v341_v14 = vmul.f32 0.2, %v337_v12 }
  0xa3   : > { %v344_v17 = vsel %vm340_vm2, %v338_v13, %v342_v15 }
  0xa4   : > { %v343_v16 = vsel %vm339_vm1, %v337_v12, %v341_v14  ;;  %347 = vst.msk [vmem:[%s256_s11 + $0x8] sm:$0xff] %vm346_vm3, %v344_v17 }
  0xa5   : > { %345 = vst [vmem:[%s256_s11] sm:$0xff] %v343_v16 }
  0xa6   : > { %625 = shalt.err (!%p622_p9)
}
  0xa7   : > { %504 = dma.vmem_to_hbm [thread:$0]  (%p749_p4), %s365_s12, 256, %s367_s9, %s349_s18  }
  0xa8 PF: > { %p516_p10 = scmp.ge.s32.totalorder %s680_s20, 2  ;;  %s378_s30 = sand.u32 1, %s660_s15  }
  0xa9   : > { %s379_s5 = scalar_lea.sflag [#allocation4], %s378_s30 }
  0xaa   : > { %p511_p11 = pnand %p516_p10, %p756_p8 }
  0xac   : > { %p512_p12 = pneg %p511_p11 }
  0xae   : > { %655 = dma.done.wait (%p512_p12), %s379_s5, 256  }
  0xaf   : > { %657 = vsyncadd (%p512_p12), %s379_s5, 4294967040  ;;  %s18_s20 = sadd.s32 1, %s680_s20   ;;  %s822_s15 = smov %s664_s16 }
  0xb0   : > { %p15_p13 = scmp.ge.s32.totalorder %s18_s20, 4   ;;  %s823_s16 = smov %s668_s17 }
  0xb1   : > { %s824_s17 = smov %s762_s28  ;;  %s825_s18 = smov %s676_s19 }
  0xb2   : > { %s826_s19 = smov %s828_s23  ;;  %17 = sbr.rel (!%p15_p13) target bundleno = 5 (0x5), region = 82 }
  0xb7   :  { %385 = vsyncpa [#allocation3], 1 }
  0xb8   :  { %387 = vsyncpa [#allocation3 + $0x1], 1 }
  0xb9   :  { %388 = vsyncpa [#allocation4], 1 }
  0xba   :  { %390 = vsyncpa [#allocation4 + $0x1], 1 }

</bundles_post_ra>
